<compile_context>
chip_gen: v5e
topology: v5e:2x2
jax: 0.10.0
libtpu: 0.0.40
codegen_flags: <defaults>
</compile_context>

<pallas_src>
import jax
import jax.numpy as jnp
from jax.experimental import pallas as pl
from jax.experimental.pallas import tpu as pltpu


def _clinical_pan_kernel(
    x_ref,                     # (TB, Dp)  f32 input tile
    wall_ref, ball_ref,        # (Dp, 256) bf16 / (1, 256) f32  [wb | wc1 | wi1 | pad]
    wc2_ref, bc2_ref,          # (64, 32)  bf16 / (1, 32)  f32
    wi2_ref,                   # (1, 16)   f32  (row vector of the 16->1 linear)
    bi2_ref,                   # (1, 1)    f32  scalar in SMEM
    wf_ref, bf_ref,            # (96, Dp)  bf16 / (1, Dp)  f32
    wr_ref, br_ref,            # (Dp, Dp)  bf16 / (1, Dp)  f32
    out_ref,                   # (TB, Dp)  f32
):
    xf = x_ref[...]                      # f32 (kept exact for the residual)
    xb = xf.astype(jnp.bfloat16)         # bf16 MXU operand

    # Fused first-stage projection: [branches | constraint_attn.0 | intensity.0]
    h_all = jnp.dot(xb, wall_ref[...], preferred_element_type=jnp.float32)
    h_all = jnp.maximum(h_all + ball_ref[...], 0.0)      # ReLU, f32 epilogue
    feat = h_all[:, 0:96]        # 3 stacked branch features (Dropout == id)
    h_c = h_all[:, 96:160]       # constraint_attn hidden
    h_i = h_all[:, 160:176]      # constraint_intensity hidden

    # constraint_attn second layer -> sigmoid, (TB, 32)
    cw = jnp.dot(h_c.astype(jnp.bfloat16), wc2_ref[...],
                 preferred_element_type=jnp.float32) + bc2_ref[...]
    cw = jax.nn.sigmoid(cw)

    # constraint_intensity: 16 -> 1 as a VPU multiply + lane reduce (no N=1 matmul)
    ci = jnp.sum(h_i * wi2_ref[...], axis=-1, keepdims=True) + bi2_ref[0, 0]
    ci = jax.nn.sigmoid(ci)                               # (TB, 1)

    # Each 32-wide branch is scaled by the same constraint weights.
    gated = feat * jnp.tile(cw, (1, 3))                   # (TB, 96)

    # fusion (96 -> Dp); ci is a per-row scalar so it commutes past the matmul.
    fused_out = jnp.dot(gated.astype(jnp.bfloat16), wf_ref[...],
                        preferred_element_type=jnp.float32)
    fused_out = fused_out * ci + bf_ref[...]

    # residual gate (Dp -> Dp) -> sigmoid
    rg = jnp.dot(xb, wr_ref[...], preferred_element_type=jnp.float32) + br_ref[...]
    rg = jax.nn.sigmoid(rg)

    out_ref[...] = (fused_out + rg * xf).astype(out_ref.dtype)


def _round_up(n, m):
    return ((n + m - 1) // m) * m


def clinical_pan_forward(x, params, *, batch_tile=256):
    """ClinicalPAN forward (eval mode) via a batch-tiled Pallas kernel."""
    B, D = x.shape
    f32, bf16 = jnp.float32, jnp.bfloat16

    Dp = _round_up(max(D, 1), 128)                 # lane-dense feature width
    TB = min(_round_up(batch_tile, 8), _round_up(B, 8))
    Bp = _round_up(B, TB)
    n_blocks = Bp // TB

    def pad2(a, rows, cols, dtype):
        out = jnp.zeros((rows, cols), dtype)
        return out.at[: a.shape[0], : a.shape[1]].set(a.astype(dtype))

    # Zero-padded input (zero rows/cols contribute nothing to the matmuls).
    xp = pad2(x, Bp, Dp, f32)

    # Fused first-stage weight: [wb (D,96) | wc1 (D,64) | wi1 (D,16)] -> 176
    # columns, zero-padded to 256 lanes / Dp contraction rows.
    w_all = jnp.concatenate([params["wb"], params["wc1"], params["wi1"]], axis=1)
    b_all = jnp.concatenate([params["bb"], params["bc1"], params["bi1"]], axis=1)
    w_all = pad2(w_all, Dp, 256, bf16)
    b_all = pad2(b_all, 1, 256, f32)

    wc2 = params["wc2"].astype(bf16)                 # (64, 32)
    bc2 = params["bc2"].astype(f32)                  # (1, 32)
    wi2 = params["wi2"].reshape(1, 16).astype(f32)   # row vector of the 16->1 linear
    bi2 = params["bi2"].reshape(1, 1).astype(f32)    # SMEM scalar
    wf = pad2(params["wf"], 96, Dp, bf16)
    bf_ = pad2(params["bf"], 1, Dp, f32)
    wr = pad2(params["wr"], Dp, Dp, bf16)
    br = pad2(params["br"], 1, Dp, f32)

    weights = (w_all, b_all, wc2, bc2, wi2, bi2, wf, bf_, wr, br)

    def resident(shape):
        # Constant block index -> fetched once, stays resident across grid steps.
        return pl.BlockSpec(shape, lambda i: (0, 0))

    in_specs = [
        pl.BlockSpec((TB, Dp), lambda i: (i, 0)),    # x tile (pipelined)
        resident(w_all.shape), resident(b_all.shape),
        resident(wc2.shape), resident(bc2.shape),
        resident(wi2.shape),
        pl.BlockSpec((1, 1), lambda i: (0, 0),
                     memory_space=pltpu.MemorySpace.SMEM),   # bi2 scalar
        resident(wf.shape), resident(bf_.shape),
        resident(wr.shape), resident(br.shape),
    ]
    out_spec = pl.BlockSpec((TB, Dp), lambda i: (i, 0))

    # VMEM budget: resident weights (x2 buffer slack) + double-buffered x/out
    # tiles + f32 intermediates + headroom.
    nbytes = lambda a: int(a.size) * a.dtype.itemsize
    resident_bytes = sum(nbytes(a) for a in weights)
    tile_bytes = 2 * 2 * (TB * Dp * 4)                       # 2-deep x + out (f32)
    act_bytes = 4 * TB * (256 + 96 + 32 + 2 * Dp) * 4
    vmem_limit = 2 * resident_bytes + tile_bytes + act_bytes + (4 << 20)
    vmem_limit = int(min(max(vmem_limit, 16 << 20), 96 << 20))

    out = pl.pallas_call(
        _clinical_pan_kernel,
        out_shape=jax.ShapeDtypeStruct((Bp, Dp), f32),
        grid=(n_blocks,),
        in_specs=in_specs,
        out_specs=out_spec,
        compiler_params=pltpu.CompilerParams(
            dimension_semantics=("parallel",),
            vmem_limit_bytes=vmem_limit,
        ),
    )(xp, *weights)
    return out[:B, :D]


def _linear_init(key, fan_in, fan_out):
    """Deterministic init mimicking torch.nn.Linear default (U(-1/sqrt(fan_in), +))."""
    kw, kb = jax.random.split(key)
    bound = 1.0 / (fan_in ** 0.5)
    w = jax.random.uniform(kw, (fan_in, fan_out), jnp.float32, -bound, bound)
    b = jax.random.uniform(kb, (1, fan_out), jnp.float32, -bound, bound)
    return w, b


def init_params(key, input_dim):
    keys = jax.random.split(key, 8)
    # 3 branch Linear(D, 32) stacked along the output dim -> (D, 96)
    wb0, bb0 = _linear_init(keys[0], input_dim, 32)
    wb1, bb1 = _linear_init(keys[1], input_dim, 32)
    wb2, bb2 = _linear_init(keys[2], input_dim, 32)
    wb = jnp.concatenate([wb0, wb1, wb2], axis=1)
    bb = jnp.concatenate([bb0, bb1, bb2], axis=1)

    wc1, bc1 = _linear_init(keys[3], input_dim, 64)
    wc2, bc2 = _linear_init(keys[4], 64, 32)
    wi1, bi1 = _linear_init(keys[5], input_dim, 16)
    wi2, bi2 = _linear_init(keys[6], 16, 1)
    wf, bf = _linear_init(keys[7], 32 * 3, input_dim)
    kr = jax.random.fold_in(key, 123)
    wr, br = _linear_init(kr, input_dim, input_dim)

    return dict(
        wb=wb, bb=bb,
        wc1=wc1, bc1=bc1, wc2=wc2, bc2=bc2,
        wi1=wi1, bi1=bi1, wi2=wi2, bi2=bi2,
        wf=wf, bf=bf, wr=wr, br=br,
    )


def _reference_forward(x, p):
    """Pure-JAX reference of the PyTorch eval-mode forward.

    Mirrors the kernel's mixed precision (bf16 MXU operands, f32 accumulate,
    f32 elementwise epilogue) so the comparison tolerance can stay tight; it
    is mathematically identical to the PyTorch module in eval mode.
    """
    bf16 = jnp.bfloat16

    def mm(a, w):
        return jnp.dot(a.astype(bf16), w.astype(bf16),
                       preferred_element_type=jnp.float32)

    h = jnp.maximum(mm(x, p["wc1"]) + p["bc1"], 0.0)
    cw = jax.nn.sigmoid(mm(h, p["wc2"]) + p["bc2"])
    hi = jnp.maximum(mm(x, p["wi1"]) + p["bi1"], 0.0)
    ci = jax.nn.sigmoid(hi @ p["wi2"] + p["bi2"])          # f32 reduce path
    feat = jnp.maximum(mm(x, p["wb"]) + p["bb"], 0.0)
    gated = feat * jnp.tile(cw, (1, 3))
    fused_out = mm(gated, p["wf"]) * ci + p["bf"]           # ci commutes past matmul
    rg = jax.nn.sigmoid(mm(x, p["wr"]) + p["br"])
    return fused_out + rg * x


if __name__ == "__main__":
    key = jax.random.PRNGKey(0)
    kx, kp = jax.random.split(key)

    batch, input_dim = 8, 16
    x = jax.random.normal(kx, (batch, input_dim), jnp.float32)
    params = init_params(kp, input_dim)

    out = clinical_pan_forward(x, params)
    out = jax.block_until_ready(out)

    ref = _reference_forward(x, params)
    assert out.shape == (batch, input_dim)
    max_err = float(jnp.max(jnp.abs(out - ref)))
    assert jnp.allclose(out, ref, atol=2e-3, rtol=2e-3), f"mismatch vs reference: {max_err}"

    print("KERNEL_OK")
</pallas_src>

<mosaic_0001>
module attributes {stable_mosaic.version = 11 : i64} {
  func.func @_clinical_pan_kernel(%arg0: i32, %arg1: memref<8x128xf32, #tpu.memory_space<vmem>>, %arg2: memref<128x256xbf16, #tpu.memory_space<vmem>>, %arg3: memref<1x256xf32, #tpu.memory_space<vmem>>, %arg4: memref<64x32xbf16, #tpu.memory_space<vmem>>, %arg5: memref<1x32xf32, #tpu.memory_space<vmem>>, %arg6: memref<1x16xf32, #tpu.memory_space<vmem>>, %arg7: memref<1x1xf32, #tpu.memory_space<smem>>, %arg8: memref<96x128xbf16, #tpu.memory_space<vmem>>, %arg9: memref<1x128xf32, #tpu.memory_space<vmem>>, %arg10: memref<128x128xbf16, #tpu.memory_space<vmem>>, %arg11: memref<1x128xf32, #tpu.memory_space<vmem>>, %arg12: memref<8x128xf32, #tpu.memory_space<vmem>>) attributes {dimension_semantics = [#tpu.dimension_semantics<parallel>], iteration_bounds = array<i64: 1>, scalar_prefetch = 0 : i64, scratch_operands = 0 : i64, tpu.core_type = #tpu.core_type<tc>, window_params = [{transform_indices = @transform_0, window_bounds = array<i64: 8, 128>}, {pipeline_mode = #tpu.pipeline_mode<synchronous>, transform_indices = @transform_1, window_bounds = array<i64: 128, 256>}, {pipeline_mode = #tpu.pipeline_mode<synchronous>, transform_indices = @transform_2, window_bounds = array<i64: 1, 256>}, {pipeline_mode = #tpu.pipeline_mode<synchronous>, transform_indices = @transform_3, window_bounds = array<i64: 64, 32>}, {pipeline_mode = #tpu.pipeline_mode<synchronous>, transform_indices = @transform_4, window_bounds = array<i64: 1, 32>}, {pipeline_mode = #tpu.pipeline_mode<synchronous>, transform_indices = @transform_5, window_bounds = array<i64: 1, 16>}, {transform_indices = @transform_6, window_bounds = array<i64: 1, 1>}, {pipeline_mode = #tpu.pipeline_mode<synchronous>, transform_indices = @transform_7, window_bounds = array<i64: 96, 128>}, {pipeline_mode = #tpu.pipeline_mode<synchronous>, transform_indices = @transform_8, window_bounds = array<i64: 1, 128>}, {pipeline_mode = #tpu.pipeline_mode<synchronous>, transform_indices = @transform_9, window_bounds = array<i64: 128, 128>}, {pipeline_mode = #tpu.pipeline_mode<synchronous>, transform_indices = @transform_10, window_bounds = array<i64: 1, 128>}, {transform_indices = @transform_11, window_bounds = array<i64: 8, 128>}]} {
    %c0 = arith.constant 0 : index
    %c0_0 = arith.constant 0 : index
    %0 = vector.load %arg1[%c0, %c0_0] : memref<8x128xf32, #tpu.memory_space<vmem>>, vector<8x128xf32>
    %1 = arith.truncf %0 : vector<8x128xf32> to vector<8x128xbf16>
    %c0_1 = arith.constant 0 : index
    %c0_2 = arith.constant 0 : index
    %2 = vector.load %arg2[%c0_1, %c0_2] : memref<128x256xbf16, #tpu.memory_space<vmem>>, vector<128x256xbf16>
    %cst = arith.constant dense<0.000000e+00> : vector<8x256xf32>
    %3 = tpu.matmul %1, %2, %cst {dimension_numbers = #tpu.dot_dimension_numbers<[1], [0], [0], [1], [0, 0, 1, 1], [], []>} : vector<8x128xbf16>, vector<128x256xbf16>, vector<8x256xf32> -> vector<8x256xf32>
    %c0_3 = arith.constant 0 : index
    %c0_4 = arith.constant 0 : index
    %4 = vector.load %arg3[%c0_3, %c0_4] : memref<1x256xf32, #tpu.memory_space<vmem>>, vector<1x256xf32>
    %5 = vector.broadcast %4 : vector<1x256xf32> to vector<8x256xf32>
    %6 = arith.addf %3, %5 : vector<8x256xf32>
    %cst_5 = arith.constant 0.000000e+00 : f32
    %7 = vector.broadcast %cst_5 : f32 to vector<8x256xf32>
    %8 = arith.maximumf %6, %7 : vector<8x256xf32>
    %9 = vector.extract_strided_slice %8 {offsets = [0, 0], sizes = [8, 96], strides = [1, 1]} : vector<8x256xf32> to vector<8x96xf32>
    %10 = vector.extract_strided_slice %8 {offsets = [0, 96], sizes = [8, 64], strides = [1, 1]} : vector<8x256xf32> to vector<8x64xf32>
    %11 = vector.extract_strided_slice %8 {offsets = [0, 160], sizes = [8, 16], strides = [1, 1]} : vector<8x256xf32> to vector<8x16xf32>
    %12 = arith.truncf %10 : vector<8x64xf32> to vector<8x64xbf16>
    %c0_6 = arith.constant 0 : index
    %c0_7 = arith.constant 0 : index
    %13 = vector.load %arg4[%c0_6, %c0_7] : memref<64x32xbf16, #tpu.memory_space<vmem>>, vector<64x32xbf16>
    %cst_8 = arith.constant dense<0.000000e+00> : vector<8x32xf32>
    %14 = tpu.matmul %12, %13, %cst_8 {dimension_numbers = #tpu.dot_dimension_numbers<[1], [0], [0], [1], [0, 0, 1, 1], [], []>} : vector<8x64xbf16>, vector<64x32xbf16>, vector<8x32xf32> -> vector<8x32xf32>
    %c0_9 = arith.constant 0 : index
    %c0_10 = arith.constant 0 : index
    %15 = vector.load %arg5[%c0_9, %c0_10] : memref<1x32xf32, #tpu.memory_space<vmem>>, vector<1x32xf32>
    %16 = vector.broadcast %15 : vector<1x32xf32> to vector<8x32xf32>
    %17 = arith.addf %14, %16 : vector<8x32xf32>
    %18 = arith.negf %17 : vector<8x32xf32>
    %19 = math.exp %18 : vector<8x32xf32>
    %cst_11 = arith.constant 1.000000e+00 : f32
    %20 = vector.broadcast %cst_11 : f32 to vector<8x32xf32>
    %21 = arith.addf %20, %19 : vector<8x32xf32>
    %22 = arith.divf %20, %21 : vector<8x32xf32>
    %c0_12 = arith.constant 0 : index
    %c0_13 = arith.constant 0 : index
    %23 = vector.load %arg6[%c0_12, %c0_13] : memref<1x16xf32, #tpu.memory_space<vmem>>, vector<1x16xf32>
    %24 = vector.broadcast %23 : vector<1x16xf32> to vector<8x16xf32>
    %25 = arith.mulf %11, %24 : vector<8x16xf32>
    %cst_14 = arith.constant dense<0.000000e+00> : vector<8xf32>
    %26 = vector.multi_reduction <add>, %25, %cst_14 [1] : vector<8x16xf32> to vector<8xf32>
    %27 = vector.shape_cast %26 : vector<8xf32> to vector<8x1xf32>
    %c0_15 = arith.constant 0 : index
    %c0_16 = arith.constant 0 : index
    %28 = memref.load %arg7[%c0_15, %c0_16] : memref<1x1xf32, #tpu.memory_space<smem>>
    %29 = vector.broadcast %28 : f32 to vector<8x1xf32>
    %30 = arith.addf %27, %29 : vector<8x1xf32>
    %31 = arith.negf %30 : vector<8x1xf32>
    %32 = math.exp %31 : vector<8x1xf32>
    %cst_17 = arith.constant 1.000000e+00 : f32
    %33 = vector.broadcast %cst_17 : f32 to vector<8x1xf32>
    %34 = arith.addf %33, %32 : vector<8x1xf32>
    %35 = arith.divf %33, %34 : vector<8x1xf32>
    %36 = tpu.concatenate %22, %22, %22 in 1 : vector<8x32xf32>, vector<8x32xf32>, vector<8x32xf32> -> vector<8x96xf32>
    %37 = arith.mulf %9, %36 : vector<8x96xf32>
    %38 = arith.truncf %37 : vector<8x96xf32> to vector<8x96xbf16>
    %c0_18 = arith.constant 0 : index
    %c0_19 = arith.constant 0 : index
    %39 = vector.load %arg8[%c0_18, %c0_19] : memref<96x128xbf16, #tpu.memory_space<vmem>>, vector<96x128xbf16>
    %cst_20 = arith.constant dense<0.000000e+00> : vector<8x128xf32>
    %40 = tpu.matmul %38, %39, %cst_20 {dimension_numbers = #tpu.dot_dimension_numbers<[1], [0], [0], [1], [0, 0, 1, 1], [], []>} : vector<8x96xbf16>, vector<96x128xbf16>, vector<8x128xf32> -> vector<8x128xf32>
    %41 = vector.broadcast %35 : vector<8x1xf32> to vector<8x128xf32>
    %42 = arith.mulf %40, %41 : vector<8x128xf32>
    %c0_21 = arith.constant 0 : index
    %c0_22 = arith.constant 0 : index
    %43 = vector.load %arg9[%c0_21, %c0_22] : memref<1x128xf32, #tpu.memory_space<vmem>>, vector<1x128xf32>
    %44 = vector.broadcast %43 : vector<1x128xf32> to vector<8x128xf32>
    %45 = arith.addf %42, %44 : vector<8x128xf32>
    %c0_23 = arith.constant 0 : index
    %c0_24 = arith.constant 0 : index
    %46 = vector.load %arg10[%c0_23, %c0_24] : memref<128x128xbf16, #tpu.memory_space<vmem>>, vector<128x128xbf16>
    %cst_25 = arith.constant dense<0.000000e+00> : vector<8x128xf32>
    %47 = tpu.matmul %1, %46, %cst_25 {dimension_numbers = #tpu.dot_dimension_numbers<[1], [0], [0], [1], [0, 0, 1, 1], [], []>} : vector<8x128xbf16>, vector<128x128xbf16>, vector<8x128xf32> -> vector<8x128xf32>
    %c0_26 = arith.constant 0 : index
    %c0_27 = arith.constant 0 : index
    %48 = vector.load %arg11[%c0_26, %c0_27] : memref<1x128xf32, #tpu.memory_space<vmem>>, vector<1x128xf32>
    %49 = vector.broadcast %48 : vector<1x128xf32> to vector<8x128xf32>
    %50 = arith.addf %47, %49 : vector<8x128xf32>
    %51 = arith.negf %50 : vector<8x128xf32>
    %52 = math.exp %51 : vector<8x128xf32>
    %cst_28 = arith.constant 1.000000e+00 : f32
    %53 = vector.broadcast %cst_28 : f32 to vector<8x128xf32>
    %54 = arith.addf %53, %52 : vector<8x128xf32>
    %55 = arith.divf %53, %54 : vector<8x128xf32>
    %56 = arith.mulf %55, %0 : vector<8x128xf32>
    %57 = arith.addf %45, %56 : vector<8x128xf32>
    %c0_29 = arith.constant 0 : index
    %c0_30 = arith.constant 0 : index
    %58 = vector.load %arg12[%c0_29, %c0_30] : memref<8x128xf32, #tpu.memory_space<vmem>>, vector<8x128xf32>
    tpu.vector_store %arg12[%c0_29, %c0_30], %57 {strides = array<i32>} : memref<8x128xf32, #tpu.memory_space<vmem>>, vector<8x128xf32>,
    return
  }
  func.func @transform_0(%arg0: i32) -> (i32, i32) {
    %c0_i32 = arith.constant 0 : i32
    %c0_i32_0 = arith.constant 0 : i32
    return %arg0, %c0_i32 : i32, i32
  }
  func.func @transform_1(%arg0: i32) -> (i32, i32) {
    %c0_i32 = arith.constant 0 : i32
    %c0_i32_0 = arith.constant 0 : i32
    %c0_i32_1 = arith.constant 0 : i32
    return %c0_i32, %c0_i32_0 : i32, i32
  }
  func.func @transform_2(%arg0: i32) -> (i32, i32) {
    %c0_i32 = arith.constant 0 : i32
    %c0_i32_0 = arith.constant 0 : i32
    %c0_i32_1 = arith.constant 0 : i32
    return %c0_i32, %c0_i32_0 : i32, i32
  }
  func.func @transform_3(%arg0: i32) -> (i32, i32) {
    %c0_i32 = arith.constant 0 : i32
    %c0_i32_0 = arith.constant 0 : i32
    %c0_i32_1 = arith.constant 0 : i32
    return %c0_i32, %c0_i32_0 : i32, i32
  }
  func.func @transform_4(%arg0: i32) -> (i32, i32) {
    %c0_i32 = arith.constant 0 : i32
    %c0_i32_0 = arith.constant 0 : i32
    %c0_i32_1 = arith.constant 0 : i32
    return %c0_i32, %c0_i32_0 : i32, i32
  }
  func.func @transform_5(%arg0: i32) -> (i32, i32) {
    %c0_i32 = arith.constant 0 : i32
    %c0_i32_0 = arith.constant 0 : i32
    %c0_i32_1 = arith.constant 0 : i32
    return %c0_i32, %c0_i32_0 : i32, i32
  }
  func.func @transform_6(%arg0: i32) -> (i32, i32) {
    %c0_i32 = arith.constant 0 : i32
    %c0_i32_0 = arith.constant 0 : i32
    %c0_i32_1 = arith.constant 0 : i32
    return %c0_i32, %c0_i32_0 : i32, i32
  }
  func.func @transform_7(%arg0: i32) -> (i32, i32) {
    %c0_i32 = arith.constant 0 : i32
    %c0_i32_0 = arith.constant 0 : i32
    %c0_i32_1 = arith.constant 0 : i32
    return %c0_i32, %c0_i32_0 : i32, i32
  }
  func.func @transform_8(%arg0: i32) -> (i32, i32) {
    %c0_i32 = arith.constant 0 : i32
    %c0_i32_0 = arith.constant 0 : i32
    %c0_i32_1 = arith.constant 0 : i32
    return %c0_i32, %c0_i32_0 : i32, i32
  }
  func.func @transform_9(%arg0: i32) -> (i32, i32) {
    %c0_i32 = arith.constant 0 : i32
    %c0_i32_0 = arith.constant 0 : i32
    %c0_i32_1 = arith.constant 0 : i32
    return %c0_i32, %c0_i32_0 : i32, i32
  }
  func.func @transform_10(%arg0: i32) -> (i32, i32) {
    %c0_i32 = arith.constant 0 : i32
    %c0_i32_0 = arith.constant 0 : i32
    %c0_i32_1 = arith.constant 0 : i32
    return %c0_i32, %c0_i32_0 : i32, i32
  }
  func.func @transform_11(%arg0: i32) -> (i32, i32) {
    %c0_i32 = arith.constant 0 : i32
    %c0_i32_0 = arith.constant 0 : i32
    return %arg0, %c0_i32 : i32, i32
  }
}

</mosaic_0001>

<bundles_post_ra>
// kernel: tpu_custom_call.1
= control target key start
LH: loop header
LB: loop body
LE: loop exit
PB: predicated region body
PF: predicated region fallthrough
CT: control target
= control target key end

     0   :  { %17 = vsyncpa [#allocation4], 0  ;;  %s1000_s0 = inlined_call_operand.hbm [shape: f32[8,128], index: 0, kind: input, shape index: {}]   ;;  %s1001_s1 = inlined_call_operand.hbm [shape: bf16[128,256], index: 1, kind: input, shape index: {}]   ;;  %s1002_s2 = inlined_call_operand.vmem [shape: f32[1,256], index: 2, kind: input, shape index: {}]   ;;  %s1003_s3 = inlined_call_operand.vmem [shape: bf16[64,32], index: 3, kind: input, shape index: {}]   ;;  %s1004_s4 = inlined_call_operand.vmem [shape: f32[1,32], index: 4, kind: input, shape index: {}]   ;;  %s1005_s5 = inlined_call_operand.vmem [shape: f32[1,16], index: 5, kind: input, shape index: {}]   ;;  %s1006_s6 = inlined_call_operand.<no memory space> [shape: f32[1,1], index: 6, kind: input, shape index: {}]   ;;  %s1007_s7 = inlined_call_operand.vmem [shape: bf16[96,128], index: 7, kind: input, shape index: {}]   ;;  %s1008_s8 = inlined_call_operand.vmem [shape: f32[1,128], index: 8, kind: input, shape index: {}]   ;;  %s1009_s9 = inlined_call_operand.hbm [shape: bf16[128,128], index: 9, kind: input, shape index: {}]   ;;  %s1010_s10 = inlined_call_operand.vmem [shape: f32[1,128], index: 10, kind: input, shape index: {}]   ;;  %s1011_s11 = inlined_call_operand.hbm [shape: f32[8,128], index: 11, kind: output, shape index: {}]  }
   0x1   :  { %18 = vsyncpa [#allocation7], 0  ;;  %s35_s19 = sshll.u32 %s1001_s1, 4  ;;  %s36_s19 = int_to_ptr.hbm [resolvable:$true] %s35_s19 }
   0x2   :  { %19 = vsyncpa [#allocation5], 0  ;;  %s844_s20 = smov [#allocation6]   ;;  %s25_s24 = sshll.u32 %s1000_s0, 4  ;;  %s26_s24 = int_to_ptr.hbm [resolvable:$true] %s25_s24 }
   0x3   :  { %s37_s21 = sshll.u32 %s844_s20, 4  ;;  %s845_s25 = smov 128   ;;  %s38_s21 = int_to_ptr.vmem [resolvable:$true] %s37_s21 }
   0x4   :  { %s846_s26 = smov 8   ;;  %s847_s27 = smov [#allocation3]  }
   0x5   :  { %43 = dma.hbm_to_vmem [thread:$0]  %s36_s19, 2048, %s38_s21, [#allocation7], %s845_s25, %s845_s25, %s846_s26  }
   0x6   :  { %s27_s28 = sshll.u32 %s847_s27, 4  ;;  %s62_s12 = sshll.u32 %s1009_s9, 4  ;;  %s28_s28 = int_to_ptr.vmem [resolvable:$true] %s27_s28  ;;  %s63_s12 = int_to_ptr.hbm [resolvable:$true] %s62_s12 }
   0x7   :  { %30 = dma.hbm_to_vmem [thread:$0]  %s26_s24, 128, %s28_s28, [#allocation4]  }
   0x8   :  { %s848_s1 = smov [#allocation8]   ;;  %s849_s14 = smov 64  }
   0x9   :  { %s64_s13 = sshll.u32 %s848_s1, 4  ;;  %s850_s15 = smov 4   ;;  %s65_s13 = int_to_ptr.vmem [resolvable:$true] %s64_s13 }
   0xa   :  { %70 = dma.hbm_to_vmem [thread:$0]  %s63_s12, 1024, %s65_s13, [#allocation7], %s849_s14, %s849_s14, %s850_s15  }
   0xb   :  { %838 = dma.done.wait [#allocation4], 128  }
   0xc   :  { %839 = vsyncadd [#allocation4], 4294967168 }
   0xd   :  { %840 = dma.done.wait [#allocation7], 3072  }
   0xe   :  { %841 = vsyncadd [#allocation7], 4294964224  ;;  %v599_v0 = vld [vmem:[#allocation6 + $0x70] sm:$0xf]  ;;  %v697_v1 = vld [vmem:[#allocation6 + $0x74] sm:$0xf0] }
   0xf   :  { %v696_v2 = vld [vmem:[#allocation6 + $0x74] sm:$0xf]  ;;  %v600_v3 = vor.u32 %v697_v1, %v599_v0  ;;  %v601_v4 = vld [vmem:[#allocation6 + $0x78] sm:$0xf0]  ;;  %v591_v5 = vld [vmem:[#allocation6 + $0x60] sm:$0xf] }
  0x10   :  { %v695_v6 = vld [vmem:[#allocation6 + $0x64] sm:$0xf0]  ;;  %v604_v7 = vor.u32 %v696_v2, %v601_v4  ;;  %v694_v8 = vld [vmem:[#allocation6 + $0x64] sm:$0xf]  ;;  %v593_v9 = vld [vmem:[#allocation6 + $0x68] sm:$0xf0] }
  0x11   :  { %190 = vmatpush.bf16.msra.mxu0 %v600_v3  ;;  %v592_v10 = vor.u32 %v695_v6, %v591_v5  ;;  %v596_v11 = vor.u32 %v694_v8, %v593_v9  ;;  %v583_v12 = vld [vmem:[#allocation6 + $0x50] sm:$0xf]  ;;  %v693_v13 = vld [vmem:[#allocation6 + $0x54] sm:$0xf0]  ;;  %v692_v14 = vld [vmem:[#allocation6 + $0x54] sm:$0xf] }
  0x12   :  { %203 = vmatpush.bf16.msra.mxu1 %v604_v7  ;;  %v585_v15 = vld [vmem:[#allocation6 + $0x58] sm:$0xf0]  ;;  %v584_v16 = vor.u32 %v693_v13, %v583_v12  ;;  %v575_v18 = vld [vmem:[#allocation6 + $0x40] sm:$0xf]  ;;  %v691_v19 = vld [vmem:[#allocation6 + $0x44] sm:$0xf0] }
  0x13   :  { %v588_v17 = vor.u32 %v692_v14, %v585_v15  ;;  %v690_v20 = vld [vmem:[#allocation6 + $0x44] sm:$0xf]  ;;  %v577_v21 = vld [vmem:[#allocation6 + $0x48] sm:$0xf0]  ;;  %v576_v22 = vor.u32 %v691_v19, %v575_v18  ;;  %v567_v23 = vld [vmem:[#allocation6 + $0x30] sm:$0xf] }
  0x14   :  { %v726_v24 = vld [vmem:[%s1005_s5] ss:$0 sm:$0xff]  ;;  %v580_v25 = vor.u32 %v690_v20, %v577_v21  ;;  %v688_v27 = vld [vmem:[#allocation6 + $0x34] sm:$0xf]  ;;  %v569_v28 = vld [vmem:[#allocation6 + $0x38] sm:$0xf0] }
  0x15   :  { %191 = vmatpush.bf16.msra.mxu0 %v592_v10  ;;  %v689_v26 = vld [vmem:[#allocation6 + $0x34] sm:$0xf0]  ;;  %s851_s16 = smov 32   ;;  %v572_v30 = vor.u32 %v688_v27, %v569_v28  ;;  %v559_v31 = vld [vmem:[#allocation6 + $0x20] sm:$0xf]  ;;  %s852_s18 = smov 96  }
  0x16   :  { %204 = vmatpush.bf16.msra.mxu1 %v596_v11  ;;  %303 = vrot.lane.b32.xlu2 %v726_v24, %s851_s16  ;;  %v568_v29 = vor.u32 %v689_v26, %v567_v23  ;;  %v687_v32 = vld [vmem:[#allocation6 + $0x24] sm:$0xf0]  ;;  %v686_v33 = vld [vmem:[#allocation6 + $0x24] sm:$0xf]  ;;  %v561_v34 = vld [vmem:[#allocation6 + $0x28] sm:$0xf0] }
  0x17   :  { %v560_v35 = vor.u32 %v687_v32, %v559_v31  ;;  %v564_v36 = vor.u32 %v686_v33, %v561_v34  ;;  %v551_v37 = vld [vmem:[#allocation6 + $0x10] sm:$0xf]  ;;  %v685_v38 = vld [vmem:[#allocation6 + $0x14] sm:$0xf0]  ;;  %v684_v39 = vld [vmem:[#allocation6 + $0x14] sm:$0xf] }
  0x18   :  { %v553_v40 = vld [vmem:[#allocation6 + $0x18] sm:$0xf0]  ;;  %v552_v41 = vor.u32 %v685_v38, %v551_v37  ;;  %v543_v43 = vld [vmem:[#allocation6] sm:$0xf]  ;;  %v683_v44 = vld [vmem:[#allocation6 + $0x4] sm:$0xf0] }
  0x19   :  { %192 = vmatpush.bf16.msra.mxu0 %v584_v16  ;;  %v556_v42 = vor.u32 %v684_v39, %v553_v40  ;;  %v682_v45 = vld [vmem:[#allocation6 + $0x4] sm:$0xf]  ;;  %v545_v46 = vld [vmem:[#allocation6 + $0x8] sm:$0xf0]  ;;  %v544_v47 = vor.u32 %v683_v44, %v543_v43  ;;  %v929_v48 = vld [vmem:[#allocation3] sm:$0xff]  ;;  %vm311_vm0 = vcmask 130048  }
  0x1a   :  { %205 = vmatpush.bf16.msra.mxu1 %v588_v17  ;;  %v548_v49 = vor.u32 %v682_v45, %v545_v46  ;;  %v933_v50 = vpack.c.bf16 %v929_v48, %v929_v48  ;;  %v104_v51 = vld [vmem:[%s1002_s2] sm:$0x3]  ;;  %v701_v2 = vld [vmem:[%s1003_s3 + $0x18] sm:$0xff]  ;;  %v700_v3 = vld [vmem:[%s1003_s3 + $0x10] sm:$0xff]  ;;  %vm238_vm1 = vcmask 261120   ;;  %vm264_vm2 = vcmask 523264  }
  0x1b   :  { %v106_v52 = vperm.slane %v104_v51, 0  ;;  %v107_v53 = vperm.slane %v104_v51, 1  ;;  %272 = vmatpush.bf16.msra.mxu3 %v701_v2  ;;  %v699_v4 = vld [vmem:[%s1003_s3 + $0x8] sm:$0xff]  ;;  %v698_v5 = vld [vmem:[%s1003_s3] sm:$0xff]  ;;  %v714_v17 = vld [vmem:[#allocation8 + $0x30] sm:$0xff]  ;;  %vm397_vm7 = vcmask 785408   ;;  %v316_v51 = vstv %s1006_s6 }
  0x1c   :  { %v727_v11 = vld [vmem:[%s1004_s4] ss:$0 sm:$0xff]  ;;  %v707_v18 = vld [vmem:[%s1007_s7 + $0x28] sm:$0xff]  ;;  %v705_v23 = vld [vmem:[%s1007_s7 + $0x18] sm:$0xff]  ;;  %s530_s21 = sshll.u32 %s1011_s11, 4  ;;  %s531_s21 = int_to_ptr.hbm [resolvable:$true] %s530_s21 }
  0x1d   :  { %193 = vmatpush.bf16.msra.mxu0 %v576_v22  ;;  %v715_v15 = vld [vmem:[#allocation8 + $0x38] sm:$0xff]  ;;  %v713_v22 = vld [vmem:[#allocation8 + $0x28] sm:$0xff]  ;;  %v712_v24 = vld [vmem:[#allocation8 + $0x20] sm:$0xff] }
  0x1e   :  { %206 = vmatpush.bf16.msra.mxu1 %v580_v25  ;;  %488 = vmatpush.bf16.msra.mxu2 %v715_v15  ;;  %v706_v20 = vld [vmem:[%s1007_s7 + $0x20] sm:$0xff]  ;;  %v710_v32 = vld [vmem:[#allocation8 + $0x10] sm:$0xff]  ;;  %v708_v38 = vld [vmem:[#allocation8] sm:$0xff] }
  0x1f   :  { %273 = vmatpush.bf16.msra.mxu3 %v700_v3  ;;  %v711_v27 = vld [vmem:[#allocation8 + $0x18] sm:$0xff]  ;;  %v704_v39 = vld [vmem:[%s1007_s7 + $0x10] sm:$0xff]  ;;  %v703_v40 = vld [vmem:[%s1007_s7 + $0x8] sm:$0xff] }
  0x21   :  { %194 = vmatpush.bf16.msra.mxu0 %v568_v29 }
  0x22   :  { %207 = vmatpush.bf16.msra.mxu1 %v572_v30  ;;  %489 = vmatpush.bf16.msra.mxu2 %v714_v17 }
  0x23   :  { %274 = vmatpush.bf16.msra.mxu3 %v699_v4 }
  0x25   :  { %195 = vmatpush.bf16.msra.mxu0 %v560_v35 }
  0x26   :  { %208 = vmatpush.bf16.msra.mxu1 %v564_v36  ;;  %490 = vmatpush.bf16.msra.mxu2 %v713_v22  ;;  %v709_v36 = vld [vmem:[#allocation8 + $0x8] sm:$0xff] }
  0x27   :  { %275 = vmatpush.bf16.msra.mxu3 %v698_v5 }
  0x29   :  { %196 = vmatpush.bf16.msra.mxu0 %v552_v41  ;;  %v702_v41 = vld [vmem:[%s1007_s7] sm:$0xff] }
  0x2a   :  { %209 = vmatpush.bf16.msra.mxu1 %v556_v42  ;;  %491 = vmatpush.bf16.msra.mxu2 %v712_v24 }
  0x2b   :  { %403 = vmatpush.bf16.msrb.mxu3 %v707_v18 }
  0x2d   :  { %197 = vmatpush.bf16.msra.mxu0 %v544_v47 }
  0x2e   :  { %210 = vmatpush.bf16.msra.mxu1 %v548_v49  ;;  %492 = vmatpush.bf16.msra.mxu2 %v711_v27 }
  0x2f   :  { %404 = vmatpush.bf16.msrb.mxu3 %v706_v20 }
  0x30   :  { %198 = vmatmul.bf16.vlgmr.msra.gmra.mxu0 %v933_v50 }
  0x31   :  { %211 = vmatmul.bf16.vlgmr.msra.gmra.mxu1 %v933_v50 }
  0x32   :  { %493 = vmatpush.bf16.msra.mxu2 %v710_v32 }
  0x33   :  { %405 = vmatpush.bf16.msrb.mxu3 %v705_v23 }
  0x36   :  { %494 = vmatpush.bf16.msra.mxu2 %v709_v36 }
  0x37   :  { %406 = vmatpush.bf16.msrb.mxu3 %v704_v39 }
  0x3a   :  { %495 = vmatpush.bf16.msra.mxu2 %v708_v38 }
  0x3b   :  { %407 = vmatpush.bf16.msrb.mxu3 %v703_v40 }
  0x3d   :  { %496 = vmatmul.bf16.vlgmr.msra.gmra.mxu2 %v933_v50 }
  0x3f   :  { %408 = vmatpush.bf16.msrb.mxu3 %v702_v41 }
  0x70   :  { %v304_v59 = vpop.permute.xlu2 %303 }
  0xad   :  { %v199_v54 = vpop.f32.mrf.mxu0 }
  0xae   :  { %v200_v55 = vadd.f32 %v199_v54, %v106_v52  ;;  %v212_v56 = vpop.f32.mrf.mxu1 }
  0xaf   :  { %v213_v57 = vadd.f32 %v212_v56, %v107_v53  ;;  %v728_v53 = vld [vmem:[%s1010_s10] ss:$0 sm:$0xff] }
  0xb0   :  { %v940_v58 = vmax.f32 %v200_v55, 0.0 }
  0xb1   :  { %v217_v60 = vmax.f32 %v213_v57, 0.0 }
  0xb2   :  { %v218_v61 = vpack.c.bf16 %v940_v58, %v940_v58 }
  0xb3   :  { %v306_v62 = vmul.f32 %v304_v59, %v217_v60  ;;  %v219_v1 = vpack.c.bf16 %v217_v60, %v217_v60 }
  0xb4   :  { %234 = vrot.lane.b32.xlu0 %v218_v61, %s851_s16 }
  0xb5   :  { %308 = vrot.lane.b32.xlu2 %v306_v62, %s852_s18  ;;  %v201_v63 = vpop.f32.mrf.mxu0  ;;  %s853_s18 = smov [#allocation9]  }
  0xb6   :  { %v214_v0 = vpop.f32.mrf.mxu1  ;;  %s528_s2 = sshll.u32 %s853_s18, 4  ;;  %s529_s2 = int_to_ptr.vmem [resolvable:$true] %s528_s2 }
  0xbc   :  { %236 = vrot.lane.b32.xlu0 %v219_v1, %s851_s16 }
  0xc0   :  { %v497_v49 = vpop.f32.mrf.mxu2 }
  0xc1   :  { %v498_v55 = vadd.f32 %v728_v53, %v497_v49 }
  0xc3   :  { %v681_v57 = vmul.f32 -1.442695, %v498_v55 }
  0xc8   :  { %v499_v50 = vpop.f32.mrf.mxu2 }
 0x10f   :  { %v309_v6 = vpop.permute.xlu2 %308 }
 0x110   :  { %v312_v7 = vsel %vm311_vm0, %v309_v6, 0.0 }
 0x111   :  { %313 = vadd.xlane.f32.xlu0 %v312_v7 }
 0x126   :  { %v235_v8 = vpop.permute.xlu0 %234 }
 0x12e   :  { %v237_v9 = vpop.permute.xlu0 %236 }
 0x12f   :  { %v239_v10 = vsel %vm238_vm1, %v235_v8, %v237_v9 }
 0x130   :  { %621 = vmatmul.msk.bf16.vlgmr.msra.gmra.mxu3 %vm264_vm2, %v239_v10 }
 0x184   :  { %v314_v52 = vpop.xlane.xlu0 %313 }
 0x185   :  { %v317_v54 = vadd.f32 %v316_v51, %v314_v52 }
 0x187   :  { %v623_v56 = vmul.f32 -1.442695, %v317_v54 }
 0x1b3   :  { %v277_v12 = vpop.f32.mrf.mxu3 }
 0x1b4   :  { %v278_v13 = vadd.f32 %v727_v11, %v277_v12 }
 0x1b6   :  { %v622_v14 = vmul.f32 -1.442695, %v278_v13 }
 0x1b8   :  { %730 = vpow2.f32 %v622_v14 }
 0x1bb   :  { %v279_v16 = vpop.f32.mrf.mxu3 }
 0x1bc   :  { %v729_v16 = vld [vmem:[%s1008_s8] ss:$0 sm:$0xff] }
 0x1be   :  { %v731_v19 = vpop.eup %730 }
 0x1bf   :  { %v284_v21 = vadd.f32 1.0, %v731_v19 }
 0x1c1   :  { %732 = vrcp.f32 %v284_v21  ;;  %v296_v29 = vand.u32 2147483648, %v284_v21  ;;  %v294_v31 = vand.u32 2147483647, %v284_v21  ;;  %vm290_vm4 = vweird.f32 %v284_v21 }
 0x1c2   :  { %734 = vpow2.f32 %v623_v56 }
 0x1c3   :  { %v297_v34 = vor.u32 1.1754944e-38, %v296_v29  ;;  %vm295_vm6 = vcmp.eq.f32.partialorder %v294_v31, 8.507059e+37  ;;  %736 = vpow2.f32 %v681_v57 }
 0x1c7   :  { %v733_v25 = vpop.eup %732 }
 0x1c8   :  { %v286_v26 = vmul.f32 %v733_v25, %v284_v21  ;;  %vm291_vm3 = vweird.f32 %v733_v25 }
 0x1c9   :  { %vm292_vm5 = vmor %vm290_vm4, %vm291_vm3 }
 0x1ca   :  { %v287_v28 = vsub.f32 1.0, %v286_v26 }
 0x1cc   :  { %v288_v30 = vmul.f32 %v733_v25, %v287_v28 }
 0x1ce   :  { %v289_v33 = vadd.f32 %v733_v25, %v288_v30 }
 0x1d0   :  { %v293_v35 = vsel %vm292_vm5, %v733_v25, %v289_v33 }
 0x1d1   :  { %v298_v37 = vsel %vm295_vm6, %v297_v34, %v293_v35 }
 0x1d2   :  { %338 = vrot.lane.b32.xlu1 %v298_v37, %s851_s16 }
 0x1da   :  { %341 = vrot.lane.b32.xlu1 %v298_v37, %s849_s14 }
 0x244   :  { %v339_v42 = vpop.permute.xlu1 %338 }
 0x245   :  { %v345_v43 = vsel %vm238_vm1, %v298_v37, %v339_v42 }
 0x24c   :  { %v342_v44 = vpop.permute.xlu1 %341 }
 0x24d   :  { %v346_v45 = vsel %vm264_vm2, %v345_v43, %v342_v44 }
 0x24e   :  { %v347_v46 = vmul.f32 %v346_v45, %v940_v58  ;;  %v735_v58 = vpop.eup %734 }
 0x24f   :  { %v737_v59 = vpop.eup %736  ;;  %v321_v60 = vadd.f32 1.0, %v735_v58 }
 0x250   :  { %v348_v47 = vpack.c.bf16 %v347_v46, %v347_v46  ;;  %v504_v61 = vadd.f32 1.0, %v737_v59 }
 0x251   :  { %738 = vrcp.f32 %v321_v60  ;;  %vm327_vm10 = vweird.f32 %v321_v60  ;;  %v333_v10 = vand.u32 2147483648, %v321_v60  ;;  %v331_v11 = vand.u32 2147483647, %v321_v60 }
 0x252   :  { %648 = vmatmul.msk.bf16.vlgmr.msrb.gmra.mxu3 %vm397_vm7, %v348_v47  ;;  %740 = vrcp.f32 %v504_v61  ;;  %vm510_vm8 = vweird.f32 %v504_v61  ;;  %v516_v6 = vand.u32 2147483648, %v504_v61  ;;  %v514_v9 = vand.u32 2147483647, %v504_v61 }
 0x253   :  { %v334_v15 = vor.u32 1.1754944e-38, %v333_v10  ;;  %vm332_vm15 = vcmp.eq.f32.partialorder %v331_v11, 8.507059e+37 }
 0x254   :  { %v517_v12 = vor.u32 1.1754944e-38, %v516_v6  ;;  %vm515_vm14 = vcmp.eq.f32.partialorder %v514_v9, 8.507059e+37 }
 0x257   :  { %v739_v62 = vpop.eup %738 }
 0x258   :  { %v741_v63 = vpop.eup %740  ;;  %v323_v1 = vmul.f32 %v739_v62, %v321_v60  ;;  %vm328_vm11 = vweird.f32 %v739_v62 }
 0x259   :  { %v506_v0 = vmul.f32 %v741_v63, %v504_v61  ;;  %vm511_vm9 = vweird.f32 %v741_v63  ;;  %vm329_vm13 = vmor %vm327_vm10, %vm328_vm11 }
 0x25a   :  { %v324_v3 = vsub.f32 1.0, %v323_v1  ;;  %vm512_vm12 = vmor %vm510_vm8, %vm511_vm9 }
 0x25b   :  { %v507_v2 = vsub.f32 1.0, %v506_v0 }
 0x25c   :  { %v325_v4 = vmul.f32 %v739_v62, %v324_v3 }
 0x25d   :  { %v508_v5 = vmul.f32 %v741_v63, %v507_v2 }
 0x25e   :  { %v326_v7 = vadd.f32 %v739_v62, %v325_v4 }
 0x25f   :  { %v509_v8 = vadd.f32 %v741_v63, %v508_v5 }
 0x260   :  { %v330_v13 = vsel %vm329_vm13, %v739_v62, %v326_v7 }
 0x261   :  { %v513_v14 = vsel %vm512_vm12, %v741_v63, %v509_v8  ;;  %v335_v17 = vsel %vm332_vm15, %v334_v15, %v330_v13 }
 0x262   :  { %v518_v19 = vsel %vm515_vm14, %v517_v12, %v513_v14 }
 0x263   :  { %v520_v22 = vmul.f32 %v518_v19, %v929_v48 }
 0x2d5   :  { %v410_v18 = vpop.f32.mrf.mxu3 }
 0x2d6   :  { %v414_v20 = vmul.f32 %v410_v18, %v335_v17 }
 0x2d8   :  { %v419_v21 = vadd.f32 %v729_v16, %v414_v20 }
 0x2da   :  { %v521_v23 = vadd.f32 %v520_v22, %v419_v21 }
 0x2dc   :  { %522 = vst [vmem:[#allocation9] sm:$0xff] %v521_v23 }
 0x2dd   :  { %v412_v24 = vpop.f32.mrf.mxu3  ;;  %533 = dma.vmem_to_hbm [thread:$0]  %s529_s2, 128, %s531_s21, [#allocation5]  }
 0x2de   :  { %842 = dma.done.wait [#allocation5], 128  }
 0x2df   :  { %843 = vsyncadd [#allocation5], 4294967168 }
 0x2e0   :  { %538 = vsyncpa [#allocation4], 1 }
 0x2e1   :  { %539 = vsyncpa [#allocation7], 1 }
 0x2e2   :  { %540 = vsyncpa [#allocation5], 1 }

</bundles_post_ra>
